<compile_context>
chip_gen: v7x
topology: tpu7x:2x2x1
jax: 0.10.0
libtpu: 0.0.40
codegen_flags: <defaults>
</compile_context>

<pallas_src>
import math

import jax
import jax.numpy as jnp
from jax import lax
from jax.experimental import pallas as pl
from jax.experimental.pallas import tpu as pltpu


# ----------------------------------------------------------------------------- #
# Kernels.  x tile: (tm, tk); weight tile: (tn, tk)  [native (N, K) layout];
# bias tile: (1, tn) f32; output tile: (tm, tn).
# ----------------------------------------------------------------------------- #

def _dot_nt(x, w):
    """(tm, tk) @ (tn, tk)^T on the MXU, contracting the last dim of both."""
    return lax.dot_general(x, w, (((1,), (1,)), ((), ())),
                           preferred_element_type=jnp.float32)


def _kernel_1k_bias(x_ref, w_ref, b_ref, o_ref):
    # Single K block: no accumulator, no init/finalize.
    o_ref[...] = (_dot_nt(x_ref[...], w_ref[...]) + b_ref[...]).astype(o_ref.dtype)


def _kernel_1k_nobias(x_ref, w_ref, o_ref):
    o_ref[...] = _dot_nt(x_ref[...], w_ref[...]).astype(o_ref.dtype)


def _kernel_kk_scratch_bias(x_ref, w_ref, b_ref, o_ref, acc_ref):
    k = pl.program_id(2)

    @pl.when(k == 0)
    def _():
        acc_ref[...] = jnp.zeros_like(acc_ref)

    acc_ref[...] += _dot_nt(x_ref[...], w_ref[...])

    @pl.when(k == pl.num_programs(2) - 1)
    def _():
        o_ref[...] = (acc_ref[...] + b_ref[...]).astype(o_ref.dtype)


def _kernel_kk_scratch_nobias(x_ref, w_ref, o_ref, acc_ref):
    k = pl.program_id(2)

    @pl.when(k == 0)
    def _():
        acc_ref[...] = jnp.zeros_like(acc_ref)

    acc_ref[...] += _dot_nt(x_ref[...], w_ref[...])

    @pl.when(k == pl.num_programs(2) - 1)
    def _():
        o_ref[...] = acc_ref[...].astype(o_ref.dtype)


def _kernel_kk_inplace_bias(x_ref, w_ref, b_ref, o_ref):
    # f32 output: accumulate directly into the resident output tile (no scratch).
    k = pl.program_id(2)

    @pl.when(k == 0)
    def _():
        o_ref[...] = jnp.zeros_like(o_ref)

    o_ref[...] += _dot_nt(x_ref[...], w_ref[...])

    @pl.when(k == pl.num_programs(2) - 1)
    def _():
        o_ref[...] += b_ref[...]


def _kernel_kk_inplace_nobias(x_ref, w_ref, o_ref):
    k = pl.program_id(2)

    @pl.when(k == 0)
    def _():
        o_ref[...] = jnp.zeros_like(o_ref)

    o_ref[...] += _dot_nt(x_ref[...], w_ref[...])


# ----------------------------------------------------------------------------- #
# Tiling helpers.
# ----------------------------------------------------------------------------- #

def _cdiv(a, b):
    return -(-a // b)


def _pick_tile(dim, preferred, align):
    """Largest tile <= preferred that is a multiple of `align`; full dim if small."""
    if dim <= align:
        return dim  # full-extent block is always a legal block shape
    return max((min(preferred, dim) // align) * align, align)


def _sublane_align(itemsize):
    # Sublane packing: f32 -> 8 rows, bf16 -> 16, int8/fp8 -> 32.
    return {1: 32, 2: 16}.get(itemsize, 8)


def _vmem_capacity_bytes():
    try:
        return int(pltpu.get_tpu_info().vmem_capacity_bytes)
    except Exception:
        return 64 * 1024 * 1024  # conservative: v7x per-TC physical VMEM


# ----------------------------------------------------------------------------- #
# Wrapper.
# ----------------------------------------------------------------------------- #

def sparse_method_linear_forward(x, weight, bias=None, *, compute_dtype=None,
                                 tile_m=None, tile_n=None, tile_k=None):
    """Forward of SparseMethodLinearIntermediate: y = x @ weight.T + bias.

    x:      (..., in_features)
    weight: (out_features, in_features)   (PyTorch convention; kept as-is, no transpose)
    bias:   (out_features,) or None
    compute_dtype: optional dtype (e.g. jnp.bfloat16) to cast the matmul inputs to
                   (f32 accumulation, output dtype unchanged).  Changes numerics.
    """
    orig_shape = x.shape
    out_dtype = x.dtype
    K = orig_shape[-1]
    N, K_w = weight.shape
    assert K == K_w, f"feature mismatch: {K} vs {K_w}"

    M = math.prod(orig_shape[:-1]) if len(orig_shape) > 1 else 1
    x2d = x.reshape(M, K)
    w2d = weight  # native (N, K): contracted on the last dim inside the kernel

    if compute_dtype is not None:
        x2d = x2d.astype(compute_dtype)
        w2d = w2d.astype(compute_dtype)

    has_bias = bias is not None
    if has_bias:
        b2d = bias.astype(jnp.float32).reshape(1, N)

    x_isz = jnp.dtype(x2d.dtype).itemsize
    w_isz = jnp.dtype(w2d.dtype).itemsize
    o_isz = jnp.dtype(out_dtype).itemsize

    # ---- Per-generation VMEM budget ---------------------------------------- #
    vmem_cap = _vmem_capacity_bytes()
    budget = min(int(vmem_cap * 0.75), 100 * 1024 * 1024)  # ~48 MiB v7x, ~96 MiB v5e/v6e
    big_vmem = budget >= 80 * 1024 * 1024

    sub = _sublane_align(x_isz)
    tm_pref = tile_m if tile_m is not None else (512 if big_vmem else 256)
    tn_pref = tile_n if tile_n is not None else (1024 if big_vmem else 512)

    tm = _pick_tile(M, tm_pref, sub)
    tn = _pick_tile(N, tn_pref, 128)

    def usage(tm_, tn_, tk_, scratch):
        b = (2 * tm_ * tk_ * x_isz      # x tile, double-buffered
             + 2 * tk_ * tn_ * w_isz    # weight tile, double-buffered
             + 2 * tm_ * tn_ * o_isz)   # output tile, double-buffered
        if has_bias:
            b += 2 * tn_ * 4            # f32 bias tile
        if scratch:
            b += tm_ * tn_ * 4          # f32 accumulator scratch
        return b

    # ---- K tiling: keep the whole contraction dim resident if possible ------ #
    if tile_k is not None:
        tk = min(tile_k, K)
        if tk <= 0 or K % tk != 0:      # contraction tile must divide K exactly
            tk = K
    else:
        tk = K
        # Shrink tn first, then tm, so the weight panel stays at tk == K
        # (weight HBM traffic stays at K*N instead of (M/tm)*K*N).
        while usage(tm, tn, tk, False) > budget and tn > 128 and (tn // 2) % 128 == 0:
            tn //= 2
        while usage(tm, tn, tk, False) > budget and tm > sub and (tm // 2) % sub == 0:
            tm //= 2
        if usage(tm, tn, tk, False) > budget:
            # Last resort: split K (lane-aligned divisor of K).
            divisors = [d for d in range(128, K, 128) if K % d == 0]
            chosen = None
            for cand in sorted(divisors, reverse=True):
                if usage(tm, tn, cand, True) <= budget:
                    chosen = cand
                    break
            tk = chosen if chosen is not None else (min(divisors) if divisors else K)

    k_steps = K // tk
    multi_k = k_steps > 1
    inplace = multi_k and jnp.dtype(out_dtype) == jnp.dtype(jnp.float32)

    # ---- Keep >=2 blocks on a parallel axis so v7x's 2 TensorCores both work - #
    if _cdiv(N, tn) * _cdiv(M, tm) == 1:
        if tn >= 256 and (tn // 2) % 128 == 0:
            tn //= 2
        elif tm >= 2 * sub and (tm // 2) % sub == 0:
            tm //= 2

    # ---- Specs / kernel selection ------------------------------------------- #
    if not multi_k:
        grid = (_cdiv(N, tn), _cdiv(M, tm))  # N outer, M inner
        x_spec = pl.BlockSpec((tm, tk), lambda j, i: (i, 0))
        w_spec = pl.BlockSpec((tn, tk), lambda j, i: (j, 0))  # constant across M steps
        b_spec = pl.BlockSpec((1, tn), lambda j, i: (0, j))
        o_spec = pl.BlockSpec((tm, tn), lambda j, i: (i, j))
        dims = ("parallel", "parallel")
        scratch = []
        kernel = _kernel_1k_bias if has_bias else _kernel_1k_nobias
    else:
        grid = (_cdiv(N, tn), _cdiv(M, tm), k_steps)  # K innermost (arbitrary)
        x_spec = pl.BlockSpec((tm, tk), lambda j, i, k: (i, k))
        w_spec = pl.BlockSpec((tn, tk), lambda j, i, k: (j, k))
        b_spec = pl.BlockSpec((1, tn), lambda j, i, k: (0, j))
        o_spec = pl.BlockSpec((tm, tn), lambda j, i, k: (i, j))
        dims = ("parallel", "parallel", "arbitrary")
        if inplace:
            scratch = []
            kernel = _kernel_kk_inplace_bias if has_bias else _kernel_kk_inplace_nobias
        else:
            scratch = [pltpu.VMEM((tm, tn), jnp.float32)]
            kernel = _kernel_kk_scratch_bias if has_bias else _kernel_kk_scratch_nobias

    in_specs = [x_spec, w_spec] + ([b_spec] if has_bias else [])
    operands = [x2d, w2d] + ([b2d] if has_bias else [])

    vmem_bytes = usage(tm, tn, tk, multi_k and not inplace)
    vmem_limit = max(int(vmem_bytes * 1.4), 16 * 1024 * 1024, vmem_bytes + (1 << 20))
    vmem_limit = min(vmem_limit, int(vmem_cap * 0.85))

    cost = pl.CostEstimate(
        flops=2 * M * K * N,
        transcendentals=0,
        bytes_accessed=(M * K * x_isz + K * N * w_isz + M * N * o_isz
                        + (N * 4 if has_bias else 0)),
    )

    out = pl.pallas_call(
        kernel,
        out_shape=jax.ShapeDtypeStruct((M, N), out_dtype),
        grid_spec=pltpu.PrefetchScalarGridSpec(
            num_scalar_prefetch=0,
            grid=grid,
            in_specs=in_specs,
            out_specs=o_spec,
            scratch_shapes=scratch,
        ),
        compiler_params=pltpu.CompilerParams(
            dimension_semantics=dims,
            vmem_limit_bytes=vmem_limit,
        ),
        cost_estimate=cost,
    )(*operands)

    return out.reshape(orig_shape[:-1] + (N,))


# ----------------------------------------------------------------------------- #
# Parameter init matching the module's _init_weights semantics.
# ----------------------------------------------------------------------------- #

def init_params(key, in_features, out_features, dtype=jnp.float32):
    """kaiming_uniform_(a=sqrt(5)) => U(-1/sqrt(fan_in), 1/sqrt(fan_in)) for both."""
    kw, kb = jax.random.split(key)
    bound = 1.0 / math.sqrt(in_features) if in_features > 0 else 0.0
    weight = jax.random.uniform(
        kw, (out_features, in_features), dtype=dtype, minval=-bound, maxval=bound)
    bias = jax.random.uniform(
        kb, (out_features,), dtype=dtype, minval=-bound, maxval=bound)
    return weight, bias


# TODO(synk): the row-sparse masked matmul (fixed_slice_matmul_kernel) only appears in
# backward of the original module; forward semantics are a plain linear layer.

if __name__ == "__main__":
    key = jax.random.PRNGKey(0)
    k_x, k_p, k_x2, k_p2, k_x3, k_p3 = jax.random.split(key, 6)

    # --- 1) Small shape, single-K-block bias path -------------------------------
    batch, seq, in_features, out_features = 2, 8, 32, 64
    x = jax.random.normal(k_x, (batch, seq, in_features), dtype=jnp.float32)
    weight, bias = init_params(k_p, in_features, out_features)

    y = jax.block_until_ready(sparse_method_linear_forward(x, weight, bias))
    y_ref = x @ weight.T + bias
    assert y.shape == (batch, seq, out_features)
    assert jnp.allclose(y, y_ref, atol=1e-5, rtol=1e-5), "mismatch (small, bias)"

    # --- 2) Same inputs, no bias (specialized no-bias kernel) -------------------
    y_nb = jax.block_until_ready(sparse_method_linear_forward(x, weight, None))
    y_nb_ref = x @ weight.T
    assert jnp.allclose(y_nb, y_nb_ref, atol=1e-5, rtol=1e-5), "mismatch (no bias)"

    # --- 3) Split-K f32 path (accumulates directly into the output tile) --------
    b2, s2, in2, out2 = 2, 64, 256, 256
    x2 = jax.random.normal(k_x2, (b2, s2, in2), dtype=jnp.float32)
    w2, bias2 = init_params(k_p2, in2, out2)
    y2 = jax.block_until_ready(
        sparse_method_linear_forward(x2, w2, bias2,
                                     tile_m=64, tile_n=128, tile_k=128))
    y2_ref = x2 @ w2.T + bias2
    assert y2.shape == (b2, s2, out2)
    assert jnp.allclose(y2, y2_ref, atol=1e-4, rtol=1e-4), "mismatch (split-K f32)"

    # --- 4) bf16 inputs, split-K with f32 scratch accumulator -------------------
    b3, s3, in3, out3 = 2, 16, 256, 128
    x3 = jax.random.normal(k_x3, (b3, s3, in3), dtype=jnp.float32).astype(jnp.bfloat16)
    w3f, bias3f = init_params(k_p3, in3, out3)
    w3 = w3f.astype(jnp.bfloat16)
    bias3 = bias3f.astype(jnp.bfloat16)
    y3 = jax.block_until_ready(
        sparse_method_linear_forward(x3, w3, bias3, tile_k=128))
    y3_ref = (x3.astype(jnp.float32) @ w3.astype(jnp.float32).T
              + bias3.astype(jnp.float32))
    assert y3.shape == (b3, s3, out3)
    assert jnp.allclose(y3.astype(jnp.float32), y3_ref, atol=2e-2, rtol=2e-2), \
        "mismatch (bf16 split-K)"

    print("KERNEL_OK")
</pallas_src>

<mosaic_0001>
module attributes {stable_mosaic.version = 11 : i64} {
  func.func @_kernel_1k_bias(%arg0: i32, %arg1: i32, %arg2: memref<8x32xf32, #tpu.memory_space<vmem>>, %arg3: memref<64x32xf32, #tpu.memory_space<vmem>>, %arg4: memref<1x64xf32, #tpu.memory_space<vmem>>, %arg5: memref<8x64xf32, #tpu.memory_space<vmem>>) attributes {dimension_semantics = [#tpu.dimension_semantics<parallel>, #tpu.dimension_semantics<parallel>], iteration_bounds = array<i64: 1, 2>, scalar_prefetch = 0 : i64, scratch_operands = 0 : i64, tpu.core_type = #tpu.core_type<tc>, window_params = [{transform_indices = @transform_0, window_bounds = array<i64: 8, 32>}, {transform_indices = @transform_1, window_bounds = array<i64: 64, 32>}, {transform_indices = @transform_2, window_bounds = array<i64: 1, 64>}, {transform_indices = @transform_3, window_bounds = array<i64: 8, 64>}]} {
    %c0 = arith.constant 0 : index
    %c0_0 = arith.constant 0 : index
    %0 = vector.load %arg2[%c0, %c0_0] : memref<8x32xf32, #tpu.memory_space<vmem>>, vector<8x32xf32>
    %c0_1 = arith.constant 0 : index
    %c0_2 = arith.constant 0 : index
    %1 = vector.load %arg3[%c0_1, %c0_2] : memref<64x32xf32, #tpu.memory_space<vmem>>, vector<64x32xf32>
    %cst = arith.constant dense<0.000000e+00> : vector<8x64xf32>
    %2 = tpu.matmul %0, %1, %cst {dimension_numbers = #tpu.dot_dimension_numbers<[1], [1], [0], [0], [0, 0, 1, 0], [], []>} : vector<8x32xf32>, vector<64x32xf32>, vector<8x64xf32> -> vector<8x64xf32>
    %c0_3 = arith.constant 0 : index
    %c0_4 = arith.constant 0 : index
    %3 = vector.load %arg4[%c0_3, %c0_4] : memref<1x64xf32, #tpu.memory_space<vmem>>, vector<1x64xf32>
    %4 = vector.broadcast %3 : vector<1x64xf32> to vector<8x64xf32>
    %5 = arith.addf %2, %4 : vector<8x64xf32>
    %c0_5 = arith.constant 0 : index
    %c0_6 = arith.constant 0 : index
    %6 = vector.load %arg5[%c0_5, %c0_6] : memref<8x64xf32, #tpu.memory_space<vmem>>, vector<8x64xf32>
    tpu.vector_store %arg5[%c0_5, %c0_6], %5 {strides = array<i32>} : memref<8x64xf32, #tpu.memory_space<vmem>>, vector<8x64xf32>,
    return
  }
  func.func @transform_0(%arg0: i32, %arg1: i32) -> (i32, i32) {
    %c0_i32 = arith.constant 0 : i32
    %c0_i32_0 = arith.constant 0 : i32
    return %arg1, %c0_i32 : i32, i32
  }
  func.func @transform_1(%arg0: i32, %arg1: i32) -> (i32, i32) {
    %c0_i32 = arith.constant 0 : i32
    %c0_i32_0 = arith.constant 0 : i32
    return %arg0, %c0_i32 : i32, i32
  }
  func.func @transform_2(%arg0: i32, %arg1: i32) -> (i32, i32) {
    %c0_i32 = arith.constant 0 : i32
    %c0_i32_0 = arith.constant 0 : i32
    return %c0_i32, %arg0 : i32, i32
  }
  func.func @transform_3(%arg0: i32, %arg1: i32) -> (i32, i32) {
    %c0_i32 = arith.constant 0 : i32
    return %arg1, %arg0 : i32, i32
  }
}

</mosaic_0001>

<bundles_post_ra>
// kernel: tpu_custom_call.1
= control target key start
LH: loop header
LB: loop body
LE: loop exit
PB: predicated region body
PF: predicated region fallthrough
CT: control target
= control target key end

     0   :  { %8 = vsyncpa [#allocation3], 0  ;;  %s825_s0 = inlined_call_operand.vmem [shape: f32[16,32], index: 0, kind: input, shape index: {}]   ;;  %s826_s1 = inlined_call_operand.vmem [shape: f32[64,32], index: 1, kind: input, shape index: {}]   ;;  %s827_s2 = inlined_call_operand.vmem [shape: f32[1,64], index: 2, kind: input, shape index: {}]   ;;  %s828_s3 = inlined_call_operand.hbm [shape: f32[16,64], index: 3, kind: output, shape index: {}]  }
   0x1   :  { %10 = vsyncpa [#allocation3 + $0x1], 0  ;;  %s671_s12 = smov 0   ;;  %s673_s13 = smov 0  }
   0x2   :  { %s675_s14 = smov 0   ;;  %s677_s15 = smov 0  }
   0x3   :  { %s679_s16 = smov 0   ;;  %s681_s17 = smov 0  }
   0x4 LB: > { %s442_s18 = sadd.s32 4294967295, %s645_s17   ;;  %s443_s19 = sadd.s32 4294967294, %s645_s17   ;;  %s645_s17 = sphi %s681_s17, %s16_s17   ;;  %s641_s16 = sphi %s679_s16, %s837_s16   ;;  %s637_s15 = sphi %s677_s15, %s836_s15   ;;  %s633_s14 = sphi %s675_s14, %s835_s14   ;;  %s629_s13 = sphi %s673_s13, %s834_s13   ;;  %s625_s12 = sphi %s671_s12, %s833_s12  }
   0x5   : > { %s25_s20 = sadd.s32 1, %s641_s16  ;;  %s115_s21 = sadd.s32 1, %s633_s14 }
   0x6   : > { %p26_p0 = scmp.ge.s32.totalorder %s25_s20, 2  ;;  %p125_p1 = scmp.ne.s32.totalorder %s633_s14, %s629_s13 }
   0x7   : > { %p126_p2 = scmp.eq.s32.totalorder %s442_s18, 1  ;;  %p131_p3 = scmp.ne.s32.totalorder %s629_s13, %s625_s12 }
   0x8   : > { %s839_s20 = smov (%p26_p0, %s25_s20), 0  ;;  %p132_p5 = scmp.eq.s32.totalorder %s443_s19, 1 }
   0x9   : > { %p711_p4 = por %p126_p2, %p125_p1  ;;  %s110_s23 = ssub.s32 %s641_s16, %s839_s20 }
   0xa   : > { %p448_p6 = scmp.ge.s32.totalorder %s645_s17, 1  ;;  %p113_p7 = scmp.eq.s32.totalorder %s110_s23, 0 }
   0xb   : > { %p718_p8 = por %p132_p5, %p131_p3  ;;  %p172_p9 = scmp.lt.s32.totalorder %s645_s17, 3 }
   0xc   : > { %s724_s25 = scalar_select %p113_p7, %s633_s14, %s115_s21  }
   0xd   : > { %p173_p10 = pnand %p448_p6, %p172_p9 }
   0xe   : > { %v217_v0 = vld [vmem:[%s826_s1] sm:$0xff] (!%p173_p10)  ;;  %v218_v1 = vld [vmem:[%s826_s1 + $0x8] sm:$0xff] (!%p173_p10)  ;;  %vm232_vm0 = vcmask (!%p173_p10), 261120   ;;  %v647_v2 = vmov (!%p173_p10), 0.0|0.0   ;;  %vm648_vm2 = vmmov (!%p173_p10), 0   ;;  %v649_v5 = vmov (!%p173_p10), 0.0  }
   0xf   : > { %176 = sbr.rel (%p173_p10) target bundleno = 276 (0x114), region = 32  ;;  %493 = vmatprep.subr.bf16.mxu0 (!%p173_p10), %v647_v2  ;;  %v494_v3 = vpack.c.bf16 (!%p173_p10), %v218_v1, %v217_v0  ;;  %vm734_vm1 = vmpackc.low (!%p173_p10), %vm232_vm0, %vm232_vm0  ;;  %490 = vmatprep.mubr.msk.f32.mxu0 (!%p173_p10), %vm648_vm2, %v649_v5  ;;  %v219_v6 = vld [vmem:[%s826_s1 + $0x10] sm:$0xff] (!%p173_p10)  ;;  %v220_v7 = vld [vmem:[%s826_s1 + $0x18] sm:$0xff] (!%p173_p10)  ;;  %p203_p11 = scmp.lt.s32.totalorder (!%p173_p10), %s637_s15, 1  ;;  %vm330_vm3 = vcmask (!%p173_p10), 523264  }
  0x10   : > { %v498_v8 = vpack.c.bf16 (!%p173_p10), %v220_v7, %v219_v6  ;;  %v221_v9 = vld [vmem:[%s826_s1 + $0x20] sm:$0xff] (!%p173_p10)  ;;  %v222_v10 = vld [vmem:[%s826_s1 + $0x28] sm:$0xff] (!%p173_p10)  ;;  %v223_v12 = vld [vmem:[%s826_s1 + $0x30] sm:$0xff] (!%p173_p10)  ;;  %s200_s30 = sand.u32 (!%p173_p10), 1, %s629_s13   ;;  %s462_s7 = sshll.u32 (!%p173_p10), %s637_s15, 7 }
  0x11   : > { %496 = vmatpush3.bf16.xpose.msk.msra.mxu0 (!%p173_p10), %vm734_vm1, %v494_v3  ;;  %v502_v11 = vpack.c.bf16 (!%p173_p10), %v222_v10, %v221_v9  ;;  %v224_v13 = vld [vmem:[%s826_s1 + $0x38] sm:$0xff] (!%p173_p10)  ;;  %s449_s4 = sshll.u32 (!%p173_p10), %s200_s30, 3  ;;  %v451_v16 = vld [vmem:[%s827_s2] ss:$0 sm:$0xff] (!%p173_p10)  ;;  %s778_s18 = scalar_lea.hbm (!%p173_p10), %s828_s3, %s462_s7 }
  0x12   : > { %497 = vmatprep.subr.bf16.mxu0 (!%p173_p10), %v647_v2  ;;  %v506_v14 = vpack.c.bf16 (!%p173_p10), %v224_v13, %v223_v12  ;;  %s202_s8 = scalar_lea.vmem (!%p173_p10), [#allocation2], %s449_s4  ;;  %s333_s19 = scalar_lea.sflag (!%p173_p10), [#allocation3], %s200_s30 }
  0x13   : > { %s347_s9 = sshll.u32 (!%p173_p10), %s202_s8, 4  ;;  %s780_s9 = int_to_ptr.vmem [resolvable:$true] %s347_s9 }
  0x14   : > { %s567_s21 = scalar_lea.vmem (!%p173_p10), %s780_s9, 128 }
  0x15   : > { %p568_p12 = scmp.ne.s32.totalorder (!%p173_p10), %s780_s9, %s567_s21 }
  0x16   : > { %s204_s23 = scalar_select %p203_p11, %s637_s15, 1 }
  0x17   : > { %p569_p13 = pnand %p568_p12, %p711_p4  ;;  %s650_s15 = smov [#allocation2]  }
  0x18   : > { %s450_s26 = sshll.u32 %s204_s23, 3  ;;  %s571_s23 = sshll.u32 %s650_s15, 4  ;;  %s572_s23 = int_to_ptr.vmem [resolvable:$false] %s571_s23 }
  0x19   : > { %500 = vmatpush3.bf16.xpose.msk.msra.mxu0 %vm734_vm1, %v498_v8  ;;  %s206_s29 = scalar_lea.vmem %s825_s0, %s450_s26  ;;  %p570_p0 = pneg %p569_p13 }
  0x1a   : > { %501 = vmatprep.subr.bf16.mxu0 %v647_v2  ;;  %v216_v15 = vld [vmem:[%s206_s29] sm:$0xff]  ;;  %s573_s26 = scalar_lea.vmem %s572_s23, 256  ;;  %p574_p1 = scmp.lt.s32.totalorder %s780_s9, %s572_s23 }
  0x1b   : > { %p575_p2 = scmp.lt.s32.totalorder %s573_s26, %s567_s21 }
  0x1d   : > { %p576_p3 = por %p575_p2, %p574_p1 }
  0x1f   : > { %p577_p5 = pnand %p576_p3, %p570_p0 }
  0x21   : > { %504 = vmatpush3.bf16.xpose.msk.msra.mxu0 %vm734_vm1, %v502_v11 }
  0x22   : > { %505 = vmatprep.subr.bf16.mxu0 %v647_v2 }
  0x29   : > { %508 = vmatpush3.bf16.xpose.msk.msra.mxu0 %vm734_vm1, %v506_v14 }
  0x30   : > { %491 = vmatmul.mubr.msk.f32.vlgmr.msra.gmra.mrb[0].mxu0 %vm232_vm0, %v216_v15 }
 0x103   : > { %v326_v17 = vpop.f32.mrb[0].mxu0 }
 0x104   : > { %v327_v18 = vadd.f32 %v451_v16, %v326_v17  ;;  %v492_v19 = vpop.f32.mrb[1].mxu0 }
 0x106   : > { %331 = vst.msk [vmem:[%s202_s8] sm:$0xff] %vm330_vm3, %v327_v18 }
 0x107   : > { %580 = shalt.err (!%p577_p5)
}
 0x108   : > { %s581_s27 = scalar_lea.hbm %s778_s18, 128  ;;  %s585_s30 = scalar_lea.hbm %s828_s3, 256 }
 0x109   : > { %p582_p6 = scmp.ne.s32.totalorder %s778_s18, %s581_s27  ;;  %p586_p10 = scmp.lt.u32.totalorder %s778_s18, %s828_s3 }
 0x10a   : > { %p587_p11 = scmp.lt.u32.totalorder %s585_s30, %s581_s27  ;;  %p589_p13 = scmp.lt.u32.totalorder %s581_s27, %s778_s18 }
 0x10b   : > { %p583_p7 = pnand %p582_p6, %p711_p4 }
 0x10c   : > { %p588_p12 = por %p587_p11, %p586_p10 }
 0x10d   : > { %p584_p9 = pneg %p583_p7 }
 0x10e   : > { %p590_p0 = por %p589_p13, %p588_p12 }
 0x110   : > { %p591_p1 = pnand %p590_p0, %p584_p9 }
 0x112   : > { %594 = shalt.err (!%p591_p1)
}
 0x113   : > { %509 = dma.vmem_to_hbm [thread:$0]  (%p711_p4), %s780_s9, 128, %s778_s18, %s333_s19  }
 0x114 PF: > { %p515_p2 = scmp.ge.s32.totalorder %s645_s17, 2  ;;  %s359_s6 = sand.u32 1, %s625_s12  }
 0x115   : > { %s360_s7 = scalar_lea.sflag [#allocation3], %s359_s6 }
 0x116   : > { %p512_p3 = pnand %p515_p2, %p718_p8 }
 0x118   : > { %620 = dma.done.wait (!%p512_p3), %s360_s7, 128  }
 0x119   : > { %622 = vsyncadd (!%p512_p3), %s360_s7, 4294967168  ;;  %s16_s17 = sadd.s32 1, %s645_s17   ;;  %s833_s12 = smov %s629_s13 }
 0x11a   : > { %p13_p5 = scmp.ge.s32.totalorder %s16_s17, 4   ;;  %s834_s13 = smov %s633_s14 }
 0x11b   : > { %s835_s14 = smov %s724_s25  ;;  %s836_s15 = smov %s641_s16 }
 0x11c   : > { %s837_s16 = smov %s839_s20  ;;  %15 = sbr.rel (!%p13_p5) target bundleno = 4 (0x4), region = 73 }
 0x123   :  { %365 = vsyncpa [#allocation3], 1 }
 0x124   :  { %367 = vsyncpa [#allocation3 + $0x1], 1 }

</bundles_post_ra>
